<compile_context>
chip_gen: v7x
topology: tpu7x:2x2x1
jax: 0.10.0
libtpu: 0.0.40
codegen_flags: <defaults>
</compile_context>

<pallas_src>
import numpy as np
import jax
import jax.numpy as jnp
from jax import lax
from jax.experimental import pallas as pl
from jax.experimental.pallas import tpu as pltpu


# ----------------------------------------------------------------------------
# Model dimensions (toy instantiation of the wrapped Sequential).
# ----------------------------------------------------------------------------
B, C_IN, H, W = 2, 4, 16, 16
C_MID, C_OUT, N_CLS = 8, 16, 10

PAD = 8        # sublane-aligned start of the valid rows inside the H-padded scratch
H_PAD = 32     # scratch rows; rows PAD-1 and PAD+H stay zero (the conv H-padding ring)


# ----------------------------------------------------------------------------
# Host-side (one-time) parameter preparation.
# ----------------------------------------------------------------------------
def _banded_conv_weight(w_hwio, width):
    """(3,3,Ci,Co) HWIO conv weight -> (3, width*Ci, width*Co) block-Toeplitz mats.

    T[kh][u*Ci+ci, x*Co+co] = w[kh, u-x+1, ci, co] inside the 3-tap band, else 0,
    so one padded activation row (lane layout x*Ci+ci) is convolved along W by a
    single MXU matmul; zero padding along W is implicit in the band structure.
    """
    _, _, ci, co = w_hwio.shape
    wnp = np.asarray(w_hwio, np.float32)
    t = np.zeros((3, width * ci, width * co), np.float32)
    for kh in range(3):
        for kw in range(3):
            for x in range(width):
                u = x + kw - 1
                if 0 <= u < width:
                    t[kh, u * ci:(u + 1) * ci, x * co:(x + 1) * co] = wnp[kh, kw]
    return t


def prepare_params(params):
    """Fold layout/permutation work into constants so the kernel does none of it."""
    b1 = np.asarray(params["b1"], np.float32)
    b2 = np.asarray(params["b2"], np.float32)
    b_fc = np.asarray(params["b_fc"], np.float32)
    w_fc = np.asarray(params["w_fc"], np.float32)          # (C_OUT*H*W, N_CLS), NCHW rows

    # FC weight reorganized so the lane-dense conv output (rows b*H+y, cols
    # x*C_OUT+c) can be consumed directly:  big[x*C_OUT+c, y*N_CLS+n].
    w_fc_big = (w_fc.reshape(C_OUT, H, W, N_CLS)
                .transpose(2, 0, 1, 3)
                .reshape(W * C_OUT, H * N_CLS))

    rows = np.arange(B * H)
    cols = np.arange(H * N_CLS)
    mask = ((rows[:, None] % H) == (cols[None, :] // N_CLS)).astype(np.float32)
    sel = np.tile(np.eye(N_CLS, dtype=np.float32), (H, 1))            # (H*N_CLS, N_CLS)
    red = np.kron(np.eye(B, dtype=np.float32), np.ones((1, H), np.float32))  # (B, B*H)

    prep = {
        "t1": _banded_conv_weight(params["w1"], W),          # (3, W*C_IN,  W*C_MID)
        "t2": _banded_conv_weight(params["w2"], W),          # (3, W*C_MID, W*C_OUT)
        "b1_row": np.tile(b1, W).reshape(1, W * C_MID),
        "b2_row": np.tile(b2, W).reshape(1, W * C_OUT),
        "w_fc_big": w_fc_big,
        "mask": mask,
        "sel": sel,
        "red": red,
        "b_fc_row": b_fc.reshape(1, N_CLS),
    }
    return {k: jnp.asarray(v, jnp.float32) for k, v in prep.items()}


# ----------------------------------------------------------------------------
# The single fused kernel.
# ----------------------------------------------------------------------------
def _fused_kernel(x_ref, t1_ref, b1_ref, t2_ref, b2_ref,
                  wfc_ref, mask_ref, sel_ref, red_ref, bfc_ref,
                  o_ref, xp_ref, hp_ref):
    # ---- H-padded copy of the input rows (zero ring rows PAD-1 / PAD+H) ----
    xp_ref[...] = jnp.zeros_like(xp_ref)
    xp_ref[:, PAD:PAD + H, :] = x_ref[...]          # sublane-aligned interior store

    # ---- conv1 (3x3 "same") + bias + ReLU: 3 banded matmuls ----
    acc1 = jnp.zeros((B * H, W * C_MID), jnp.float32)
    for kh in range(3):
        win = xp_ref[:, PAD - 1 + kh:PAD - 1 + kh + H, :].reshape(B * H, W * C_IN)
        acc1 = acc1 + jnp.dot(win, t1_ref[kh], preferred_element_type=jnp.float32)
    hidden = jnp.maximum(acc1 + b1_ref[...], 0.0)   # (B*H, W*C_MID), lane-dense

    # ---- H-padded copy of the hidden activation for conv2's windows ----
    hp_ref[...] = jnp.zeros_like(hp_ref)
    hp_ref[:, PAD:PAD + H, :] = hidden.reshape(B, H, W * C_MID)

    # ---- conv2 (3x3 "same") + bias ----
    acc2 = jnp.zeros((B * H, W * C_OUT), jnp.float32)
    for kh in range(3):
        win = hp_ref[:, PAD - 1 + kh:PAD - 1 + kh + H, :].reshape(B * H, W * C_MID)
        acc2 = acc2 + jnp.dot(win, t2_ref[kh], preferred_element_type=jnp.float32)
    feat = acc2 + b2_ref[...]                       # (B*H, W*C_OUT), lane-dense
    # TODO(synk): backward hook (register_hook/setgrad) on this activation has
    # no forward-only equivalent and is omitted.

    # ---- classifier head (NCHW Flatten folded into wfc/mask/sel/red) ----
    p = jnp.dot(feat, wfc_ref[...], preferred_element_type=jnp.float32)   # (B*H, H*N_CLS)
    p = p * mask_ref[...]
    per_row = jnp.dot(p, sel_ref[...], preferred_element_type=jnp.float32)  # (B*H, N_CLS)
    o_ref[...] = (jnp.dot(red_ref[...], per_row, preferred_element_type=jnp.float32)
                  + bfc_ref[...])                                          # (B, N_CLS)


_fused_forward = pl.pallas_call(
    _fused_kernel,
    out_shape=jax.ShapeDtypeStruct((B, N_CLS), jnp.float32),
    in_specs=[pl.BlockSpec(memory_space=pltpu.MemorySpace.VMEM) for _ in range(10)],
    out_specs=pl.BlockSpec(memory_space=pltpu.MemorySpace.VMEM),
    scratch_shapes=[
        pltpu.VMEM((B, H_PAD, W * C_IN), jnp.float32),    # padded input rows
        pltpu.VMEM((B, H_PAD, W * C_MID), jnp.float32),   # padded hidden rows
    ],
    # Everything fits VMEM at these shapes; for real image sizes one would add a
    # grid over (batch, row-tiles) with dimension_semantics=("parallel", ...) so
    # v7x's two TensorCores both get work and VMEM tiles stay bounded.
)


# ----------------------------------------------------------------------------
# GradModel.forward:  last_conv(x) -> (hook: forward no-op) -> head
# ----------------------------------------------------------------------------
@jax.jit
def grad_model_forward(x_nchw, prep):
    # NCHW -> lane-dense rows (B, H, W*C_IN); the only XLA op outside the kernel.
    x_rows = jnp.transpose(x_nchw, (0, 2, 3, 1)).reshape(B, H, W * C_IN)
    return _fused_forward(x_rows, prep["t1"], prep["b1_row"], prep["t2"],
                          prep["b2_row"], prep["w_fc_big"], prep["mask"],
                          prep["sel"], prep["red"], prep["b_fc_row"])


# ----------------------------------------------------------------------------
# Pure-JAX reference for verification (mirrors the PyTorch module).
# ----------------------------------------------------------------------------
def reference_forward(x_nchw, params):
    x = jnp.transpose(x_nchw, (0, 2, 3, 1))
    dn = lax.conv_dimension_numbers(x.shape, params["w1"].shape,
                                    ("NHWC", "HWIO", "NHWC"))
    h = lax.conv_general_dilated(x, params["w1"], (1, 1), "SAME",
                                 dimension_numbers=dn) + params["b1"]
    h = jnp.maximum(h, 0.0)
    dn2 = lax.conv_dimension_numbers(h.shape, params["w2"].shape,
                                     ("NHWC", "HWIO", "NHWC"))
    f = lax.conv_general_dilated(h, params["w2"], (1, 1), "SAME",
                                 dimension_numbers=dn2) + params["b2"]
    f = jnp.transpose(f, (0, 3, 1, 2)).reshape(x.shape[0], -1)   # NCHW Flatten
    return f @ params["w_fc"] + params["b_fc"]


if __name__ == "__main__":
    key = jax.random.PRNGKey(0)
    kx, k1, k2, k3, k4, k5, k6 = jax.random.split(key, 7)

    x = jax.random.normal(kx, (B, C_IN, H, W), jnp.float32)

    params = {
        "w1": 0.1 * jax.random.normal(k1, (3, 3, C_IN, C_MID), jnp.float32),
        "b1": 0.1 * jax.random.normal(k2, (C_MID,), jnp.float32),
        "w2": 0.1 * jax.random.normal(k3, (3, 3, C_MID, C_OUT), jnp.float32),
        "b2": 0.1 * jax.random.normal(k4, (C_OUT,), jnp.float32),
        "w_fc": 0.05 * jax.random.normal(k5, (C_OUT * H * W, N_CLS), jnp.float32),
        "b_fc": 0.05 * jax.random.normal(k6, (N_CLS,), jnp.float32),
    }

    prep = prepare_params(params)

    out = grad_model_forward(x, prep)
    out = jax.block_until_ready(out)

    ref = reference_forward(x, params)
    assert out.shape == (B, N_CLS)
    assert jnp.allclose(out, ref, atol=1e-3, rtol=1e-3), "mismatch vs reference"

    print("KERNEL_OK")
</pallas_src>

<mosaic_0001>
module attributes {stable_mosaic.version = 11 : i64} {
  func.func @_fused_kernel(%arg0: memref<2x16x64xf32, #tpu.memory_space<vmem>>, %arg1: memref<3x64x128xf32, #tpu.memory_space<vmem>>, %arg2: memref<1x128xf32, #tpu.memory_space<vmem>>, %arg3: memref<3x128x256xf32, #tpu.memory_space<vmem>>, %arg4: memref<1x256xf32, #tpu.memory_space<vmem>>, %arg5: memref<256x160xf32, #tpu.memory_space<vmem>>, %arg6: memref<32x160xf32, #tpu.memory_space<vmem>>, %arg7: memref<160x10xf32, #tpu.memory_space<vmem>>, %arg8: memref<2x32xf32, #tpu.memory_space<vmem>>, %arg9: memref<1x10xf32, #tpu.memory_space<vmem>>, %arg10: memref<2x10xf32, #tpu.memory_space<vmem>>, %arg11: memref<2x32x64xf32, #tpu.memory_space<vmem>>, %arg12: memref<2x32x128xf32, #tpu.memory_space<vmem>>) attributes {dimension_semantics = [], scalar_prefetch = 0 : i64, scratch_operands = 2 : i64, tpu.core_type = #tpu.core_type<tc>} {
    %cst = arith.constant 0.000000e+00 : f32
    %0 = vector.broadcast %cst : f32 to vector<2x32x64xf32>
    %c0 = arith.constant 0 : index
    %c0_0 = arith.constant 0 : index
    %c0_1 = arith.constant 0 : index
    %1 = vector.load %arg11[%c0, %c0_0, %c0_1] : memref<2x32x64xf32, #tpu.memory_space<vmem>>, vector<2x32x64xf32>
    tpu.vector_store %arg11[%c0, %c0_0, %c0_1], %0 {strides = array<i32>} : memref<2x32x64xf32, #tpu.memory_space<vmem>>, vector<2x32x64xf32>,
    %c0_2 = arith.constant 0 : index
    %c0_3 = arith.constant 0 : index
    %c0_4 = arith.constant 0 : index
    %2 = vector.load %arg0[%c0_2, %c0_3, %c0_4] : memref<2x16x64xf32, #tpu.memory_space<vmem>>, vector<2x16x64xf32>
    %c0_5 = arith.constant 0 : index
    %c8 = arith.constant 8 : index
    %c0_6 = arith.constant 0 : index
    %3 = vector.load %arg11[%c0_5, %c8, %c0_6] : memref<2x32x64xf32, #tpu.memory_space<vmem>>, vector<2x16x64xf32>
    tpu.vector_store %arg11[%c0_5, %c8, %c0_6], %2 {strides = array<i32>} : memref<2x32x64xf32, #tpu.memory_space<vmem>>, vector<2x16x64xf32>,
    %cst_7 = arith.constant 0.000000e+00 : f32
    %4 = vector.broadcast %cst_7 : f32 to vector<32x128xf32>
    %c0_8 = arith.constant 0 : index
    %c7 = arith.constant 7 : index
    %c0_9 = arith.constant 0 : index
    %5 = vector.load %arg11[%c0_8, %c7, %c0_9] : memref<2x32x64xf32, #tpu.memory_space<vmem>>, vector<2x16x64xf32>
    %6 = vector.shape_cast %5 : vector<2x16x64xf32> to vector<32x64xf32>
    %c0_10 = arith.constant 0 : index
    %c0_11 = arith.constant 0 : index
    %c0_12 = arith.constant 0 : index
    %7 = vector.load %arg1[%c0_10, %c0_11, %c0_12] : memref<3x64x128xf32, #tpu.memory_space<vmem>>, vector<1x64x128xf32>
    %8 = vector.shape_cast %7 : vector<1x64x128xf32> to vector<64x128xf32>
    %cst_13 = arith.constant dense<0.000000e+00> : vector<32x128xf32>
    %9 = tpu.matmul %6, %8, %cst_13 {dimension_numbers = #tpu.dot_dimension_numbers<[1], [0], [0], [1], [0, 0, 1, 1], [], []>} : vector<32x64xf32>, vector<64x128xf32>, vector<32x128xf32> -> vector<32x128xf32>
    %10 = arith.addf %4, %9 : vector<32x128xf32>
    %c0_14 = arith.constant 0 : index
    %c8_15 = arith.constant 8 : index
    %c0_16 = arith.constant 0 : index
    %11 = vector.load %arg11[%c0_14, %c8_15, %c0_16] : memref<2x32x64xf32, #tpu.memory_space<vmem>>, vector<2x16x64xf32>
    %12 = vector.shape_cast %11 : vector<2x16x64xf32> to vector<32x64xf32>
    %c1 = arith.constant 1 : index
    %c0_17 = arith.constant 0 : index
    %c0_18 = arith.constant 0 : index
    %13 = vector.load %arg1[%c1, %c0_17, %c0_18] : memref<3x64x128xf32, #tpu.memory_space<vmem>>, vector<1x64x128xf32>
    %14 = vector.shape_cast %13 : vector<1x64x128xf32> to vector<64x128xf32>
    %cst_19 = arith.constant dense<0.000000e+00> : vector<32x128xf32>
    %15 = tpu.matmul %12, %14, %cst_19 {dimension_numbers = #tpu.dot_dimension_numbers<[1], [0], [0], [1], [0, 0, 1, 1], [], []>} : vector<32x64xf32>, vector<64x128xf32>, vector<32x128xf32> -> vector<32x128xf32>
    %16 = arith.addf %10, %15 : vector<32x128xf32>
    %c0_20 = arith.constant 0 : index
    %c9 = arith.constant 9 : index
    %c0_21 = arith.constant 0 : index
    %17 = vector.load %arg11[%c0_20, %c9, %c0_21] : memref<2x32x64xf32, #tpu.memory_space<vmem>>, vector<2x16x64xf32>
    %18 = vector.shape_cast %17 : vector<2x16x64xf32> to vector<32x64xf32>
    %c2 = arith.constant 2 : index
    %c0_22 = arith.constant 0 : index
    %c0_23 = arith.constant 0 : index
    %19 = vector.load %arg1[%c2, %c0_22, %c0_23] : memref<3x64x128xf32, #tpu.memory_space<vmem>>, vector<1x64x128xf32>
    %20 = vector.shape_cast %19 : vector<1x64x128xf32> to vector<64x128xf32>
    %cst_24 = arith.constant dense<0.000000e+00> : vector<32x128xf32>
    %21 = tpu.matmul %18, %20, %cst_24 {dimension_numbers = #tpu.dot_dimension_numbers<[1], [0], [0], [1], [0, 0, 1, 1], [], []>} : vector<32x64xf32>, vector<64x128xf32>, vector<32x128xf32> -> vector<32x128xf32>
    %22 = arith.addf %16, %21 : vector<32x128xf32>
    %c0_25 = arith.constant 0 : index
    %c0_26 = arith.constant 0 : index
    %23 = vector.load %arg2[%c0_25, %c0_26] : memref<1x128xf32, #tpu.memory_space<vmem>>, vector<1x128xf32>
    %24 = vector.broadcast %23 : vector<1x128xf32> to vector<32x128xf32>
    %25 = arith.addf %22, %24 : vector<32x128xf32>
    %cst_27 = arith.constant 0.000000e+00 : f32
    %26 = vector.broadcast %cst_27 : f32 to vector<32x128xf32>
    %27 = arith.maximumf %25, %26 : vector<32x128xf32>
    %cst_28 = arith.constant 0.000000e+00 : f32
    %28 = vector.broadcast %cst_28 : f32 to vector<2x32x128xf32>
    %c0_29 = arith.constant 0 : index
    %c0_30 = arith.constant 0 : index
    %c0_31 = arith.constant 0 : index
    %29 = vector.load %arg12[%c0_29, %c0_30, %c0_31] : memref<2x32x128xf32, #tpu.memory_space<vmem>>, vector<2x32x128xf32>
    tpu.vector_store %arg12[%c0_29, %c0_30, %c0_31], %28 {strides = array<i32>} : memref<2x32x128xf32, #tpu.memory_space<vmem>>, vector<2x32x128xf32>,
    %30 = vector.shape_cast %27 : vector<32x128xf32> to vector<2x16x128xf32>
    %c0_32 = arith.constant 0 : index
    %c8_33 = arith.constant 8 : index
    %c0_34 = arith.constant 0 : index
    %31 = vector.load %arg12[%c0_32, %c8_33, %c0_34] : memref<2x32x128xf32, #tpu.memory_space<vmem>>, vector<2x16x128xf32>
    tpu.vector_store %arg12[%c0_32, %c8_33, %c0_34], %30 {strides = array<i32>} : memref<2x32x128xf32, #tpu.memory_space<vmem>>, vector<2x16x128xf32>,
    %cst_35 = arith.constant 0.000000e+00 : f32
    %32 = vector.broadcast %cst_35 : f32 to vector<32x256xf32>
    %c0_36 = arith.constant 0 : index
    %c7_37 = arith.constant 7 : index
    %c0_38 = arith.constant 0 : index
    %33 = vector.load %arg12[%c0_36, %c7_37, %c0_38] : memref<2x32x128xf32, #tpu.memory_space<vmem>>, vector<2x16x128xf32>
    %34 = vector.shape_cast %33 : vector<2x16x128xf32> to vector<32x128xf32>
    %c0_39 = arith.constant 0 : index
    %c0_40 = arith.constant 0 : index
    %c0_41 = arith.constant 0 : index
    %35 = vector.load %arg3[%c0_39, %c0_40, %c0_41] : memref<3x128x256xf32, #tpu.memory_space<vmem>>, vector<1x128x256xf32>
    %36 = vector.shape_cast %35 : vector<1x128x256xf32> to vector<128x256xf32>
    %cst_42 = arith.constant dense<0.000000e+00> : vector<32x256xf32>
    %37 = tpu.matmul %34, %36, %cst_42 {dimension_numbers = #tpu.dot_dimension_numbers<[1], [0], [0], [1], [0, 0, 1, 1], [], []>} : vector<32x128xf32>, vector<128x256xf32>, vector<32x256xf32> -> vector<32x256xf32>
    %38 = arith.addf %32, %37 : vector<32x256xf32>
    %c0_43 = arith.constant 0 : index
    %c8_44 = arith.constant 8 : index
    %c0_45 = arith.constant 0 : index
    %39 = vector.load %arg12[%c0_43, %c8_44, %c0_45] : memref<2x32x128xf32, #tpu.memory_space<vmem>>, vector<2x16x128xf32>
    %40 = vector.shape_cast %39 : vector<2x16x128xf32> to vector<32x128xf32>
    %c1_46 = arith.constant 1 : index
    %c0_47 = arith.constant 0 : index
    %c0_48 = arith.constant 0 : index
    %41 = vector.load %arg3[%c1_46, %c0_47, %c0_48] : memref<3x128x256xf32, #tpu.memory_space<vmem>>, vector<1x128x256xf32>
    %42 = vector.shape_cast %41 : vector<1x128x256xf32> to vector<128x256xf32>
    %cst_49 = arith.constant dense<0.000000e+00> : vector<32x256xf32>
    %43 = tpu.matmul %40, %42, %cst_49 {dimension_numbers = #tpu.dot_dimension_numbers<[1], [0], [0], [1], [0, 0, 1, 1], [], []>} : vector<32x128xf32>, vector<128x256xf32>, vector<32x256xf32> -> vector<32x256xf32>
    %44 = arith.addf %38, %43 : vector<32x256xf32>
    %c0_50 = arith.constant 0 : index
    %c9_51 = arith.constant 9 : index
    %c0_52 = arith.constant 0 : index
    %45 = vector.load %arg12[%c0_50, %c9_51, %c0_52] : memref<2x32x128xf32, #tpu.memory_space<vmem>>, vector<2x16x128xf32>
    %46 = vector.shape_cast %45 : vector<2x16x128xf32> to vector<32x128xf32>
    %c2_53 = arith.constant 2 : index
    %c0_54 = arith.constant 0 : index
    %c0_55 = arith.constant 0 : index
    %47 = vector.load %arg3[%c2_53, %c0_54, %c0_55] : memref<3x128x256xf32, #tpu.memory_space<vmem>>, vector<1x128x256xf32>
    %48 = vector.shape_cast %47 : vector<1x128x256xf32> to vector<128x256xf32>
    %cst_56 = arith.constant dense<0.000000e+00> : vector<32x256xf32>
    %49 = tpu.matmul %46, %48, %cst_56 {dimension_numbers = #tpu.dot_dimension_numbers<[1], [0], [0], [1], [0, 0, 1, 1], [], []>} : vector<32x128xf32>, vector<128x256xf32>, vector<32x256xf32> -> vector<32x256xf32>
    %50 = arith.addf %44, %49 : vector<32x256xf32>
    %c0_57 = arith.constant 0 : index
    %c0_58 = arith.constant 0 : index
    %51 = vector.load %arg4[%c0_57, %c0_58] : memref<1x256xf32, #tpu.memory_space<vmem>>, vector<1x256xf32>
    %52 = vector.broadcast %51 : vector<1x256xf32> to vector<32x256xf32>
    %53 = arith.addf %50, %52 : vector<32x256xf32>
    %c0_59 = arith.constant 0 : index
    %c0_60 = arith.constant 0 : index
    %54 = vector.load %arg5[%c0_59, %c0_60] : memref<256x160xf32, #tpu.memory_space<vmem>>, vector<256x160xf32>
    %cst_61 = arith.constant dense<0.000000e+00> : vector<32x160xf32>
    %55 = tpu.matmul %53, %54, %cst_61 {dimension_numbers = #tpu.dot_dimension_numbers<[1], [0], [0], [1], [0, 0, 1, 1], [], []>} : vector<32x256xf32>, vector<256x160xf32>, vector<32x160xf32> -> vector<32x160xf32>
    %c0_62 = arith.constant 0 : index
    %c0_63 = arith.constant 0 : index
    %56 = vector.load %arg6[%c0_62, %c0_63] : memref<32x160xf32, #tpu.memory_space<vmem>>, vector<32x160xf32>
    %57 = arith.mulf %55, %56 : vector<32x160xf32>
    %c0_64 = arith.constant 0 : index
    %c0_65 = arith.constant 0 : index
    %58 = vector.load %arg7[%c0_64, %c0_65] : memref<160x10xf32, #tpu.memory_space<vmem>>, vector<160x10xf32>
    %cst_66 = arith.constant dense<0.000000e+00> : vector<32x10xf32>
    %59 = tpu.matmul %57, %58, %cst_66 {dimension_numbers = #tpu.dot_dimension_numbers<[1], [0], [0], [1], [0, 0, 1, 1], [], []>} : vector<32x160xf32>, vector<160x10xf32>, vector<32x10xf32> -> vector<32x10xf32>
    %c0_67 = arith.constant 0 : index
    %c0_68 = arith.constant 0 : index
    %60 = vector.load %arg8[%c0_67, %c0_68] : memref<2x32xf32, #tpu.memory_space<vmem>>, vector<2x32xf32>
    %cst_69 = arith.constant dense<0.000000e+00> : vector<2x10xf32>
    %61 = tpu.matmul %60, %59, %cst_69 {dimension_numbers = #tpu.dot_dimension_numbers<[1], [0], [0], [1], [0, 0, 1, 1], [], []>} : vector<2x32xf32>, vector<32x10xf32>, vector<2x10xf32> -> vector<2x10xf32>
    %c0_70 = arith.constant 0 : index
    %c0_71 = arith.constant 0 : index
    %62 = vector.load %arg9[%c0_70, %c0_71] : memref<1x10xf32, #tpu.memory_space<vmem>>, vector<1x10xf32>
    %63 = vector.broadcast %62 : vector<1x10xf32> to vector<2x10xf32>
    %64 = arith.addf %61, %63 : vector<2x10xf32>
    %c0_72 = arith.constant 0 : index
    %c0_73 = arith.constant 0 : index
    %65 = vector.load %arg10[%c0_72, %c0_73] : memref<2x10xf32, #tpu.memory_space<vmem>>, vector<2x10xf32>
    tpu.vector_store %arg10[%c0_72, %c0_73], %64 {strides = array<i32>} : memref<2x10xf32, #tpu.memory_space<vmem>>, vector<2x10xf32>,
    return
  }
}

</mosaic_0001>

<bundles_post_ra>
// kernel: grad_model_forward.1
= control target key start
LH: loop header
LB: loop body
LE: loop exit
PB: predicated region body
PF: predicated region fallthrough
CT: control target
= control target key end

     0   :  { %vm36_vm0 = vcmask 523264   ;;  %v1716_v5 = vmov 0.0   ;;  %s2512_s0 = inlined_call_operand.vmem [shape: f32[2,16,64], index: 0, kind: input, shape index: {}]   ;;  %s2513_s1 = inlined_call_operand.vmem [shape: f32[3,64,128], index: 1, kind: input, shape index: {}]   ;;  %s2514_s2 = inlined_call_operand.vmem [shape: f32[1,128], index: 2, kind: input, shape index: {}]   ;;  %s2515_s3 = inlined_call_operand.vmem [shape: f32[3,128,256], index: 3, kind: input, shape index: {}]   ;;  %s2516_s4 = inlined_call_operand.vmem [shape: f32[1,256], index: 4, kind: input, shape index: {}]   ;;  %s2517_s5 = inlined_call_operand.vmem [shape: f32[256,160], index: 5, kind: input, shape index: {}]   ;;  %s2518_s6 = inlined_call_operand.vmem [shape: f32[32,160], index: 6, kind: input, shape index: {}]   ;;  %s2519_s7 = inlined_call_operand.vmem [shape: f32[160,10], index: 7, kind: input, shape index: {}]   ;;  %s2520_s8 = inlined_call_operand.vmem [shape: f32[2,32], index: 8, kind: input, shape index: {}]   ;;  %s2521_s9 = inlined_call_operand.vmem [shape: f32[1,10], index: 9, kind: input, shape index: {}]   ;;  %s2522_s10 = inlined_call_operand.hbm [shape: f32[2,10], index: 10, kind: output, shape index: {}]  }
   0x1   :  { %v1202_v0 = vld [vmem:[%s2513_s1 + $0x40] sm:$0xff]  ;;  %v1203_v1 = vld [vmem:[%s2513_s1 + $0x48] sm:$0xff]  ;;  %v1204_v2 = vld [vmem:[%s2513_s1 + $0x50] sm:$0xff]  ;;  %38 = vst.msk [vmem:[#allocation2 + $0x8] sm:$0xff] %vm36_vm0, %v1716_v5  ;;  %550 = vmatprep.mubr.f32.mxu1 %v1716_v5 }
   0x2   :  { %v1419_v3 = vpack.c.bf16 %v1203_v1, %v1202_v0  ;;  %v1205_v4 = vld [vmem:[%s2513_s1 + $0x58] sm:$0xff]  ;;  %37 = vst.msk [vmem:[#allocation2] sm:$0xff] %vm36_vm0, %v1716_v5  ;;  %39 = vst.msk [vmem:[#allocation2 + $0x10] sm:$0xff] %vm36_vm0, %v1716_v5  ;;  %v1206_v7 = vld [vmem:[%s2513_s1 + $0x60] sm:$0xff] }
   0x3   :  { %40 = vst.msk [vmem:[#allocation2 + $0x18] sm:$0xff] %vm36_vm0, %v1716_v5  ;;  %41 = vst.msk [vmem:[#allocation2 + $0x20] sm:$0xff] %vm36_vm0, %v1716_v5  ;;  %v1423_v6 = vpack.c.bf16 %v1205_v4, %v1204_v2  ;;  %v1207_v8 = vld [vmem:[%s2513_s1 + $0x68] sm:$0xff]  ;;  %v45_v9 = vld [vmem:[%s2512_s0] sm:$0xff] }
   0x4   :  { %42 = vst.msk [vmem:[#allocation2 + $0x28] sm:$0xff] %vm36_vm0, %v1716_v5  ;;  %43 = vst.msk [vmem:[#allocation2 + $0x30] sm:$0xff] %vm36_vm0, %v1716_v5  ;;  %1420 = vmatprep.subr.bf16.mxu0 %v1419_v3  ;;  %v46_v10 = vld [vmem:[%s2512_s0 + $0x8] sm:$0xff]  ;;  %v1427_v11 = vpack.c.bf16 %v1207_v8, %v1206_v7  ;;  %v47_v12 = vld [vmem:[%s2512_s0 + $0x10] sm:$0xff] }
   0x5   :  { %44 = vst.msk [vmem:[#allocation2 + $0x38] sm:$0xff] %vm36_vm0, %v1716_v5  ;;  %401 = vst [vmem:[#allocation3] sm:$0xff] %v1716_v5  ;;  %1422 = vmatpush3.bf16.msra.mxu0 %v1419_v3  ;;  %v1208_v13 = vld [vmem:[%s2513_s1 + $0x70] sm:$0xff]  ;;  %v1209_v14 = vld [vmem:[%s2513_s1 + $0x78] sm:$0xff] }
   0x6   :  { %404 = vst [vmem:[#allocation3 + $0x18] sm:$0xff] %v1716_v5  ;;  %405 = vst [vmem:[#allocation3 + $0x20] sm:$0xff] %v1716_v5  ;;  %1424 = vmatprep.subr.bf16.mxu0 %v1423_v6  ;;  %v48_v15 = vld [vmem:[%s2512_s0 + $0x18] sm:$0xff]  ;;  %v1431_v16 = vpack.c.bf16 %v1209_v14, %v1208_v13  ;;  %v57_v17 = vld [vmem:[%s2513_s1] sm:$0xff] }
   0x7   :  { %408 = vst [vmem:[#allocation3 + $0x38] sm:$0xff] %v1716_v5  ;;  %49 = vst.msk [vmem:[#allocation2 + $0x8] sm:$0xff] %vm36_vm0, %v45_v9  ;;  %v1232_v18 = vld [vmem:[%s2515_s3 + $0x108] sm:$0xff]  ;;  %v1234_v19 = vld [vmem:[%s2515_s3 + $0x118] sm:$0xff] }
   0x8   :  { %50 = vst.msk [vmem:[#allocation2 + $0x10] sm:$0xff] %vm36_vm0, %v46_v10  ;;  %51 = vst.msk [vmem:[#allocation2 + $0x28] sm:$0xff] %vm36_vm0, %v47_v12  ;;  %v58_v21 = vld [vmem:[%s2513_s1 + $0x8] sm:$0xff]  ;;  %v1467_v22 = vpack.c.bf16 %v1234_v19, %v1232_v18  ;;  %v1231_v23 = vld [vmem:[%s2515_s3 + $0x100] sm:$0xff] }
   0x9   :  { %52 = vst.msk [vmem:[#allocation2 + $0x30] sm:$0xff] %vm36_vm0, %v48_v15  ;;  %1426 = vmatpush3.bf16.msra.mxu0 %v1423_v6  ;;  %v1233_v24 = vld [vmem:[%s2515_s3 + $0x110] sm:$0xff]  ;;  %v1236_v25 = vld [vmem:[%s2515_s3 + $0x128] sm:$0xff]  ;;  %v1435_v26 = vpack.c.bf16 %v58_v21, %v57_v17  ;;  %v1238_v28 = vld [vmem:[%s2515_s3 + $0x138] sm:$0xff] }
   0xa   :  { %1428 = vmatprep.subr.bf16.mxu0 %v1427_v11  ;;  %1468 = vmatprep.subr.bf16.mxu1 %v1467_v22  ;;  %v1469_v27 = vpack.c.bf16 %v1233_v24, %v1231_v23  ;;  %v59_v29 = vld [vmem:[%s2513_s1 + $0x10] sm:$0xff]  ;;  %v60_v30 = vld [vmem:[%s2513_s1 + $0x18] sm:$0xff]  ;;  %v1471_v31 = vpack.c.bf16 %v1238_v28, %v1236_v25  ;;  %v1235_v33 = vld [vmem:[%s2515_s3 + $0x120] sm:$0xff] }
   0xb   :  { %v1237_v34 = vld [vmem:[%s2515_s3 + $0x130] sm:$0xff]  ;;  %v1240_v36 = vld [vmem:[%s2515_s3 + $0x148] sm:$0xff]  ;;  %v1242_v37 = vld [vmem:[%s2515_s3 + $0x158] sm:$0xff]  ;;  %v1439_v39 = vpack.c.bf16 %v60_v30, %v59_v29 }
   0xc   :  { %1470 = vmatpush1.bf16.msra.mxu1 %v1469_v27  ;;  %v1473_v35 = vpack.c.bf16 %v1237_v34, %v1235_v33  ;;  %v1239_v38 = vld [vmem:[%s2515_s3 + $0x140] sm:$0xff]  ;;  %v1475_v42 = vpack.c.bf16 %v1242_v37, %v1240_v36  ;;  %v1241_v43 = vld [vmem:[%s2515_s3 + $0x150] sm:$0xff]  ;;  %v62_v44 = vld [vmem:[%s2513_s1 + $0x28] sm:$0xff] }
   0xd   :  { %1430 = vmatpush3.bf16.msra.mxu0 %v1427_v11  ;;  %1472 = vmatprep.subr.bf16.mxu1 %v1471_v31  ;;  %v61_v40 = vld [vmem:[%s2513_s1 + $0x20] sm:$0xff]  ;;  %v1244_v45 = vld [vmem:[%s2515_s3 + $0x168] sm:$0xff]  ;;  %v1246_v46 = vld [vmem:[%s2515_s3 + $0x178] sm:$0xff]  ;;  %v1477_v48 = vpack.c.bf16 %v1241_v43, %v1239_v38 }
   0xe   :  { %v65_v20 = vld [vmem:[#allocation2 + $0x8] sm:$0xff]  ;;  %1432 = vmatprep.subr.bf16.mxu0 %v1431_v16  ;;  %v1243_v49 = vld [vmem:[%s2515_s3 + $0x160] sm:$0xff]  ;;  %v1245_v50 = vld [vmem:[%s2515_s3 + $0x170] sm:$0xff] }
   0xf   :  { %1358 = vmatprep.mubr.msk.f32.mxu0 %vm36_vm0, %v65_v20  ;;  %v66_v32 = vld [vmem:[#allocation2 + $0x10] sm:$0xff]  ;;  %v67_v41 = vld [vmem:[#allocation2 + $0x28] sm:$0xff] }
  0x10   :  { %v68_v47 = vld [vmem:[#allocation2 + $0x30] sm:$0xff]  ;;  %1474 = vmatpush1.bf16.msra.mxu1 %v1473_v35 }
  0x11   :  { %1434 = vmatpush3.bf16.msra.mxu0 %v1431_v16 }
  0x12   :  { %1436 = vmatprep.subr.bf16.mxu0 %v1435_v26 }
  0x14   :  { %1359 = vmatmul.mubr.msk.f32.vlgmr.msra.gmra.mrb[0].mxu0 %vm36_vm0, %v66_v32 }
  0x15   :  { %1438 = vmatpush3.bf16.msra.mxu0 %v1435_v26  ;;  %1361 = vmatprep.mubr.msk.f32.mxu0 %vm36_vm0, %v67_v41 }
  0x16   :  { %15 = vsyncpa [#allocation5], 0  ;;  %1440 = vmatprep.subr.bf16.mxu0 %v1439_v39  ;;  %v1443_v51 = vpack.c.bf16 %v62_v44, %v61_v40  ;;  %v53_v52 = vld [vmem:[#allocation2 + $0x7] sm:$0xff]  ;;  %1476 = vmatprep.subr.bf16.mxu1 %v1475_v42  ;;  %v1479_v53 = vpack.c.bf16 %v1246_v46, %v1244_v45  ;;  %v1250_v55 = vld [vmem:[%s2515_s3 + $0x198] sm:$0xff]  ;;  %v1481_v58 = vpack.c.bf16 %v1245_v50, %v1243_v49  ;;  %vm1007_vm1 = vcmask 261120   ;;  %s1719_s22 = smov [#allocation4]  }
  0x17   :  { %v1248_v54 = vld [vmem:[%s2515_s3 + $0x188] sm:$0xff]  ;;  %v63_v56 = vld [vmem:[%s2513_s1 + $0x30] sm:$0xff]  ;;  %v64_v57 = vld [vmem:[%s2513_s1 + $0x38] sm:$0xff]  ;;  %1478 = vmatpush1.bf16.msra.mxu1 %v1477_v48  ;;  %vm1718_vm2 = vmmov 0   ;;  %s1194_s23 = sshll.u32 %s1719_s22, 4  ;;  %vm1186_vm3 = vcmask 74752   ;;  %s1195_s23 = int_to_ptr.vmem [resolvable:$true] %s1194_s23 }
  0x18   :  { %1362 = vmatmul.mubr.msk.f32.gmra.mrb[2].mxu0 %vm36_vm0, %v68_v47  ;;  %v1483_v59 = vpack.c.bf16 %v1250_v55, %v1248_v54  ;;  %v1247_v60 = vld [vmem:[%s2515_s3 + $0x180] sm:$0xff]  ;;  %v1249_v61 = vld [vmem:[%s2515_s3 + $0x190] sm:$0xff]  ;;  %v1447_v62 = vpack.c.bf16 %v64_v57, %v63_v56  ;;  %1480 = vmatprep.subr.bf16.mxu1 %v1479_v53  ;;  %v1219_v0 = vld [vmem:[%s2513_s1 + $0x88] sm:$0xff]  ;;  %s1692_s0 = scalar_lea.vmem %s1195_s23, 32  ;;  %p1697_p1 = scmp.lt.s32.totalorder %s1195_s23, %s1195_s23 }
  0x19   :  { %1442 = vmatpush3.bf16.msra.mxu0 %v1439_v39  ;;  %1380 = vmatprep.mubr.msk.f32.mxu0 %vm36_vm0, %v53_v52  ;;  %v1218_v63 = vld [vmem:[%s2513_s1 + $0x80] sm:$0xff]  ;;  %v1485_v1 = vpack.c.bf16 %v1249_v61, %v1247_v60  ;;  %v1220_v3 = vld [vmem:[%s2513_s1 + $0x90] sm:$0xff]  ;;  %v1221_v4 = vld [vmem:[%s2513_s1 + $0x98] sm:$0xff]  ;;  %p1693_p0 = scmp.ne.s32.totalorder %s1195_s23, %s1692_s0  ;;  %p1698_p2 = scmp.lt.s32.totalorder %s1692_s0, %s1692_s0 }
  0x1a   :  { %1444 = vmatprep.subr.bf16.mxu0 %v1443_v51  ;;  %v1451_v2 = vpack.c.bf16 %v1219_v0, %v1218_v63  ;;  %v54_v6 = vld [vmem:[#allocation2 + $0xf] sm:$0xff]  ;;  %v1455_v7 = vpack.c.bf16 %v1221_v4, %v1220_v3  ;;  %v55_v8 = vld [vmem:[#allocation2 + $0x27] sm:$0xff]  ;;  %v1225_v15 = vld [vmem:[%s2513_s1 + $0xb8] sm:$0xff] }
  0x1b   :  { %1482 = vmatpush1.bf16.msra.mxu1 %v1481_v58  ;;  %v1222_v9 = vld [vmem:[%s2513_s1 + $0xa0] sm:$0xff]  ;;  %v1223_v10 = vld [vmem:[%s2513_s1 + $0xa8] sm:$0xff]  ;;  %v1224_v14 = vld [vmem:[%s2513_s1 + $0xb0] sm:$0xff]  ;;  %p1699_p3 = por %p1698_p2, %p1697_p1 }
  0x1c   :  { %1484 = vmatprep.subr.bf16.mxu1 %v1483_v59  ;;  %v56_v11 = vld [vmem:[#allocation2 + $0x2f] sm:$0xff]  ;;  %v1459_v12 = vpack.c.bf16 %v1223_v10, %v1222_v9  ;;  %v1463_v16 = vpack.c.bf16 %v1225_v15, %v1224_v14  ;;  %v1254_v21 = vld [vmem:[%s2515_s3 + $0x1b8] sm:$0xff]  ;;  %v1251_v23 = vld [vmem:[%s2515_s3 + $0x1a0] sm:$0xff] }
  0x1d   :  { %1446 = vmatpush3.bf16.msra.mxu0 %v1443_v51  ;;  %v272_v13 = vld [vmem:[#allocation2 + $0x9] sm:$0xff]  ;;  %v273_v17 = vld [vmem:[#allocation2 + $0x11] sm:$0xff]  ;;  %v1255_v29 = vld [vmem:[%s2515_s3 + $0x1c0] sm:$0xff]  ;;  %p1700_p4 = pnand %p1699_p3, %p1693_p0 }
  0x1e   :  { %1448 = vmatprep.subr.bf16.mxu0 %v1447_v62  ;;  %v274_v18 = vld [vmem:[#allocation2 + $0x29] sm:$0xff]  ;;  %v275_v19 = vld [vmem:[#allocation2 + $0x31] sm:$0xff]  ;;  %v1259_v35 = vld [vmem:[%s2515_s3 + $0x1e0] sm:$0xff] }
  0x1f   :  { %1486 = vmatpush1.bf16.msra.mxu1 %v1485_v1  ;;  %v1252_v20 = vld [vmem:[%s2515_s3 + $0x1a8] sm:$0xff]  ;;  %v1253_v24 = vld [vmem:[%s2515_s3 + $0x1b0] sm:$0xff]  ;;  %v1258_v27 = vld [vmem:[%s2515_s3 + $0x1d8] sm:$0xff] }
  0x20   :  { %v1487_v22 = vpack.c.bf16 %v1254_v21, %v1252_v20  ;;  %v1489_v25 = vpack.c.bf16 %v1253_v24, %v1251_v23  ;;  %v1256_v26 = vld [vmem:[%s2515_s3 + $0x1c8] sm:$0xff]  ;;  %v1257_v30 = vld [vmem:[%s2515_s3 + $0x1d0] sm:$0xff]  ;;  %v1262_v33 = vld [vmem:[%s2515_s3 + $0x1f8] sm:$0xff] }
  0x21   :  { %1450 = vmatpush3.bf16.msra.mxu0 %v1447_v62  ;;  %v1491_v28 = vpack.c.bf16 %v1258_v27, %v1256_v26  ;;  %v1493_v31 = vpack.c.bf16 %v1257_v30, %v1255_v29  ;;  %v1260_v32 = vld [vmem:[%s2515_s3 + $0x1e8] sm:$0xff]  ;;  %v1261_v36 = vld [vmem:[%s2515_s3 + $0x1f0] sm:$0xff]  ;;  %v420_v39 = vld [vmem:[%s2515_s3 + $0x18] sm:$0xff] }
  0x22   :  { %1452 = vmatprep.subr.bf16.mxu0 %v1451_v2  ;;  %1488 = vmatprep.subr.bf16.mxu1 %v1487_v22  ;;  %v1495_v34 = vpack.c.bf16 %v1262_v33, %v1260_v32  ;;  %v1497_v37 = vpack.c.bf16 %v1261_v36, %v1259_v35  ;;  %v418_v38 = vld [vmem:[%s2515_s3 + $0x8] sm:$0xff]  ;;  %v821_v42 = vld [vmem:[%s2517_s5 + $0x18] sm:$0xff]  ;;  %v818_v43 = vld [vmem:[%s2517_s5] sm:$0xff] }
  0x23   :  { %1490 = vmatpush1.bf16.msra.mxu1 %v1489_v25  ;;  %v1499_v40 = vpack.c.bf16 %v420_v39, %v418_v38  ;;  %v819_v41 = vld [vmem:[%s2517_s5 + $0x8] sm:$0xff]  ;;  %v820_v45 = vld [vmem:[%s2517_s5 + $0x10] sm:$0xff]  ;;  %v825_v47 = vld [vmem:[%s2517_s5 + $0x38] sm:$0xff] }
  0x24   :  { %1381 = vmatmul.mubr.msk.f32.vlgmr.msra.gmra.mrb[0].mxu0 %vm36_vm0, %v54_v6  ;;  %1492 = vmatprep.subr.bf16.mxu1 %v1491_v28  ;;  %v1563_v44 = vpack.c.bf16 %v821_v42, %v819_v41  ;;  %v823_v46 = vld [vmem:[%s2517_s5 + $0x28] sm:$0xff]  ;;  %v1565_v48 = vpack.c.bf16 %v820_v45, %v818_v43  ;;  %v822_v50 = vld [vmem:[%s2517_s5 + $0x20] sm:$0xff]  ;;  %v824_v51 = vld [vmem:[%s2517_s5 + $0x30] sm:$0xff] }
  0x25   :  { %1454 = vmatpush3.bf16.msra.mxu0 %v1451_v2  ;;  %1383 = vmatprep.mubr.msk.f32.mxu0 %vm36_vm0, %v55_v8  ;;  %v1567_v49 = vpack.c.bf16 %v825_v47, %v823_v46  ;;  %v827_v52 = vld [vmem:[%s2517_s5 + $0x48] sm:$0xff]  ;;  %v829_v53 = vld [vmem:[%s2517_s5 + $0x58] sm:$0xff]  ;;  %v1569_v54 = vpack.c.bf16 %v824_v51, %v822_v50  ;;  %v826_v56 = vld [vmem:[%s2517_s5 + $0x40] sm:$0xff] }
  0x26   :  { %1456 = vmatprep.subr.bf16.mxu0 %v1455_v7  ;;  %v1571_v55 = vpack.c.bf16 %v829_v53, %v827_v52  ;;  %v828_v57 = vld [vmem:[%s2517_s5 + $0x50] sm:$0xff]  ;;  %v831_v58 = vld [vmem:[%s2517_s5 + $0x68] sm:$0xff]  ;;  %v833_v59 = vld [vmem:[%s2517_s5 + $0x78] sm:$0xff] }
  0x27   :  { %1494 = vmatpush1.bf16.msra.mxu1 %v1493_v31  ;;  %v1573_v60 = vpack.c.bf16 %v828_v57, %v826_v56  ;;  %v1575_v61 = vpack.c.bf16 %v833_v59, %v831_v58  ;;  %v830_v62 = vld [vmem:[%s2517_s5 + $0x60] sm:$0xff]  ;;  %v832_v63 = vld [vmem:[%s2517_s5 + $0x70] sm:$0xff]  ;;  %v835_v0 = vld [vmem:[%s2517_s5 + $0x88] sm:$0xff] }
  0x28   :  { %1384 = vmatmul.mubr.msk.f32.gmra.mrb[2].mxu0 %vm36_vm0, %v56_v11  ;;  %1496 = vmatprep.subr.bf16.mxu1 %v1495_v34  ;;  %v837_v1 = vld [vmem:[%s2517_s5 + $0x98] sm:$0xff]  ;;  %v1577_v2 = vpack.c.bf16 %v832_v63, %v830_v62  ;;  %v834_v4 = vld [vmem:[%s2517_s5 + $0x80] sm:$0xff]  ;;  %v836_v6 = vld [vmem:[%s2517_s5 + $0x90] sm:$0xff] }
  0x29   :  { %1458 = vmatpush3.bf16.msra.mxu0 %v1455_v7  ;;  %1402 = vmatprep.mubr.msk.f32.mxu0 %vm36_vm0, %v272_v13  ;;  %v1579_v3 = vpack.c.bf16 %v837_v1, %v835_v0  ;;  %v839_v7 = vld [vmem:[%s2517_s5 + $0xa8] sm:$0xff]  ;;  %v841_v8 = vld [vmem:[%s2517_s5 + $0xb8] sm:$0xff]  ;;  %v1581_v9 = vpack.c.bf16 %v836_v6, %v834_v4  ;;  %v838_v11 = vld [vmem:[%s2517_s5 + $0xa0] sm:$0xff] }
  0x2a   :  { %1460 = vmatprep.subr.bf16.mxu0 %v1459_v12  ;;  %v1583_v10 = vpack.c.bf16 %v841_v8, %v839_v7  ;;  %v843_v13 = vld [vmem:[%s2517_s5 + $0xc8] sm:$0xff]  ;;  %v845_v14 = vld [vmem:[%s2517_s5 + $0xd8] sm:$0xff]  ;;  %v846_v23 = vld [vmem:[%s2517_s5 + $0xe0] sm:$0xff] }
  0x2b   :  { %1498 = vmatpush1.bf16.msra.mxu1 %v1497_v37  ;;  %v849_v20 = vld [vmem:[%s2517_s5 + $0xf8] sm:$0xff]  ;;  %v848_v24 = vld [vmem:[%s2517_s5 + $0xf0] sm:$0xff]  ;;  %v851_v25 = vld [vmem:[%s2517_s5 + $0x108] sm:$0xff] }
  0x2c   :  { %1500 = vmatprep.subr.bf16.mxu1 %v1499_v40  ;;  %v853_v26 = vld [vmem:[%s2517_s5 + $0x118] sm:$0xff]  ;;  %v1593_v27 = vpack.c.bf16 %v848_v24, %v846_v23  ;;  %v850_v29 = vld [vmem:[%s2517_s5 + $0x100] sm:$0xff]  ;;  %v852_v30 = vld [vmem:[%s2517_s5 + $0x110] sm:$0xff] }
  0x2d   :  { %1462 = vmatpush3.bf16.msra.mxu0 %v1459_v12  ;;  %v840_v12 = vld [vmem:[%s2517_s5 + $0xb0] sm:$0xff]  ;;  %v1595_v28 = vpack.c.bf16 %v853_v26, %v851_v25  ;;  %v855_v31 = vld [vmem:[%s2517_s5 + $0x128] sm:$0xff]  ;;  %v857_v32 = vld [vmem:[%s2517_s5 + $0x138] sm:$0xff]  ;;  %v1597_v33 = vpack.c.bf16 %v852_v30, %v850_v29 }
  0x2e   :  { %1464 = vmatprep.subr.bf16.mxu0 %v1463_v16  ;;  %v1585_v15 = vpack.c.bf16 %v840_v12, %v838_v11  ;;  %v1599_v34 = vpack.c.bf16 %v857_v32, %v855_v31  ;;  %v854_v35 = vld [vmem:[%s2517_s5 + $0x120] sm:$0xff]  ;;  %v856_v36 = vld [vmem:[%s2517_s5 + $0x130] sm:$0xff]  ;;  %v859_v37 = vld [vmem:[%s2517_s5 + $0x148] sm:$0xff] }
  0x2f   :  { %v861_v38 = vld [vmem:[%s2517_s5 + $0x158] sm:$0xff]  ;;  %v1601_v39 = vpack.c.bf16 %v856_v36, %v854_v35  ;;  %v858_v41 = vld [vmem:[%s2517_s5 + $0x140] sm:$0xff]  ;;  %v860_v42 = vld [vmem:[%s2517_s5 + $0x150] sm:$0xff] }
  0x30   :  { %v1603_v40 = vpack.c.bf16 %v861_v38, %v859_v37  ;;  %v863_v43 = vld [vmem:[%s2517_s5 + $0x168] sm:$0xff]  ;;  %v1605_v45 = vpack.c.bf16 %v860_v42, %v858_v41  ;;  %v862_v47 = vld [vmem:[%s2517_s5 + $0x160] sm:$0xff]  ;;  %v869_v50 = vld [vmem:[%s2517_s5 + $0x198] sm:$0xff] }
  0x31   :  { %1466 = vmatpush3.bf16.msra.mxu0 %v1463_v16  ;;  %v1587_v16 = vpack.c.bf16 %v845_v14, %v843_v13  ;;  %v1230_v51 = vld [vmem:[%s2514_s2] ss:$0 sm:$0xff]  ;;  %v419_v58 = vld [vmem:[%s2515_s3 + $0x10] sm:$0xff]  ;;  %v422_v59 = vld [vmem:[%s2515_s3 + $0x28] sm:$0xff] }
  0x32   :  { %1564 = vmatprep.subr.bf16.mxu0 %v1563_v44  ;;  %v865_v44 = vld [vmem:[%s2517_s5 + $0x178] sm:$0xff]  ;;  %v417_v57 = vld [vmem:[%s2515_s3] sm:$0xff]  ;;  %v871_v63 = vld [vmem:[%s2517_s5 + $0x1a8] sm:$0xff] }
  0x33   :  { %v1607_v46 = vpack.c.bf16 %v865_v44, %v863_v43  ;;  %v424_v62 = vld [vmem:[%s2515_s3 + $0x38] sm:$0xff]  ;;  %v1501_v4 = vpack.c.bf16 %v419_v58, %v417_v57  ;;  %v870_v6 = vld [vmem:[%s2517_s5 + $0x1a0] sm:$0xff]  ;;  %v872_v7 = vld [vmem:[%s2517_s5 + $0x1b0] sm:$0xff] }
  0x34   :  { %1403 = vmatmul.mubr.msk.f32.vlgmr.msra.gmra.mrb[0].mxu0 %vm36_vm0, %v273_v17  ;;  %v842_v17 = vld [vmem:[%s2517_s5 + $0xc0] sm:$0xff]  ;;  %v873_v0 = vld [vmem:[%s2517_s5 + $0x1b8] sm:$0xff]  ;;  %v423_v12 = vld [vmem:[%s2515_s3 + $0x30] sm:$0xff] }
  0x35   :  { %1405 = vmatprep.mubr.msk.f32.mxu0 %vm36_vm0, %v274_v18  ;;  %1566 = vmatpush1.bf16.msra.mxu0 %v1565_v48  ;;  %v844_v18 = vld [vmem:[%s2517_s5 + $0xd0] sm:$0xff]  ;;  %v421_v11 = vld [vmem:[%s2515_s3 + $0x20] sm:$0xff]  ;;  %v426_v13 = vld [vmem:[%s2515_s3 + $0x48] sm:$0xff]  ;;  %v1615_v14 = vpack.c.bf16 %v873_v0, %v871_v63 }
  0x36   :  { %1568 = vmatprep.subr.bf16.mxu0 %v1567_v49  ;;  %v1589_v21 = vpack.c.bf16 %v844_v18, %v842_v17  ;;  %v864_v48 = vld [vmem:[%s2517_s5 + $0x170] sm:$0xff]  ;;  %v867_v49 = vld [vmem:[%s2517_s5 + $0x188] sm:$0xff]  ;;  %v428_v17 = vld [vmem:[%s2515_s3 + $0x58] sm:$0xff]  ;;  %v1505_v23 = vpack.c.bf16 %v423_v12, %v421_v11 }
  0x37   :  { %v1609_v52 = vpack.c.bf16 %v864_v48, %v862_v47  ;;  %v1611_v53 = vpack.c.bf16 %v869_v50, %v867_v49  ;;  %v875_v18 = vld [vmem:[%s2517_s5 + $0x1c8] sm:$0xff]  ;;  %v874_v24 = vld [vmem:[%s2517_s5 + $0x1c0] sm:$0xff]  ;;  %v876_v25 = vld [vmem:[%s2517_s5 + $0x1d0] sm:$0xff] }
  0x38   :  { %1406 = vmatmul.mubr.msk.f32.gmra.mrb[2].mxu0 %vm36_vm0, %v275_v19  ;;  %v847_v19 = vld [vmem:[%s2517_s5 + $0xe8] sm:$0xff]  ;;  %v427_v29 = vld [vmem:[%s2515_s3 + $0x50] sm:$0xff]  ;;  %v432_v32 = vld [vmem:[%s2515_s3 + $0x78] sm:$0xff] }
  0x39   :  { %1570 = vmatpush1.bf16.msra.mxu0 %v1569_v54  ;;  %v1591_v22 = vpack.c.bf16 %v849_v20, %v847_v19  ;;  %v866_v54 = vld [vmem:[%s2517_s5 + $0x180] sm:$0xff]  ;;  %v877_v19 = vld [vmem:[%s2517_s5 + $0x1d8] sm:$0xff]  ;;  %v430_v31 = vld [vmem:[%s2515_s3 + $0x68] sm:$0xff] }
  0x3a   :  { %1572 = vmatprep.subr.bf16.mxu0 %v1571_v55  ;;  %v868_v55 = vld [vmem:[%s2517_s5 + $0x190] sm:$0xff]  ;;  %v1619_v30 = vpack.c.bf16 %v877_v19, %v875_v18  ;;  %v1511_v35 = vpack.c.bf16 %v432_v32, %v430_v31  ;;  %v429_v36 = vld [vmem:[%s2515_s3 + $0x60] sm:$0xff]  ;;  %v434_v38 = vld [vmem:[%s2515_s3 + $0x88] sm:$0xff] }
  0x3b   :  { %v431_v37 = vld [vmem:[%s2515_s3 + $0x70] sm:$0xff]  ;;  %v433_v42 = vld [vmem:[%s2515_s3 + $0x80] sm:$0xff]  ;;  %v438_v44 = vld [vmem:[%s2515_s3 + $0xa8] sm:$0xff] }
  0x3c   :  { %v435_v43 = vld [vmem:[%s2515_s3 + $0x90] sm:$0xff]  ;;  %v437_v48 = vld [vmem:[%s2515_s3 + $0xa0] sm:$0xff]  ;;  %v442_v50 = vld [vmem:[%s2515_s3 + $0xc8] sm:$0xff] }
  0x3d   :  { %1574 = vmatpush1.bf16.msra.mxu0 %v1573_v60  ;;  %v439_v49 = vld [vmem:[%s2515_s3 + $0xb0] sm:$0xff]  ;;  %v448_v57 = vld [vmem:[%s2515_s3 + $0xf8] sm:$0xff]  ;;  %v1272_v12 = vld [vmem:[%s2515_s3 + $0x248] sm:$0xff] }
  0x3e   :  { %1576 = vmatprep.subr.bf16.mxu0 %v1575_v61  ;;  %v1266_v63 = vld [vmem:[%s2515_s3 + $0x218] sm:$0xff]  ;;  %v1276_v19 = vld [vmem:[%s2515_s3 + $0x268] sm:$0xff]  ;;  %v1281_v31 = vld [vmem:[%s2515_s3 + $0x290] sm:$0xff] }
  0x41   :  { %1578 = vmatpush1.bf16.msra.mxu0 %v1577_v2  ;;  %v1613_v2 = vpack.c.bf16 %v868_v55, %v866_v54  ;;  %v441_v54 = vld [vmem:[%s2515_s3 + $0xc0] sm:$0xff]  ;;  %v443_v55 = vld [vmem:[%s2515_s3 + $0xd0] sm:$0xff] }
  0x42   :  { %1580 = vmatprep.subr.bf16.mxu0 %v1579_v3  ;;  %v1525_v58 = vpack.c.bf16 %v443_v55, %v441_v54 }
  0x45   :  { %1582 = vmatpush1.bf16.msra.mxu0 %v1581_v9 }
  0x46   :  { %1584 = vmatprep.subr.bf16.mxu0 %v1583_v10  ;;  %v1503_v10 = vpack.c.bf16 %v424_v62, %v422_v59  ;;  %v1264_v62 = vld [vmem:[%s2515_s3 + $0x208] sm:$0xff] }
  0x49   :  { %1586 = vmatpush1.bf16.msra.mxu0 %v1585_v15 }
  0x4a   :  { %1588 = vmatprep.subr.bf16.mxu0 %v1587_v16 }
  0x4d   :  { %1590 = vmatpush1.bf16.msra.mxu0 %v1589_v21  ;;  %v1617_v21 = vpack.c.bf16 %v872_v7, %v870_v6  ;;  %v1270_v6 = vld [vmem:[%s2515_s3 + $0x238] sm:$0xff] }
  0x4e   :  { %1592 = vmatprep.subr.bf16.mxu0 %v1591_v22 }
  0x51   :  { %1594 = vmatpush1.bf16.msra.mxu0 %v1593_v27  ;;  %v1507_v27 = vpack.c.bf16 %v428_v17, %v426_v13  ;;  %v1274_v13 = vld [vmem:[%s2515_s3 + $0x258] sm:$0xff]  ;;  %v1273_v17 = vld [vmem:[%s2515_s3 + $0x250] sm:$0xff] }
  0x52   :  { %1596 = vmatprep.subr.bf16.mxu0 %v1595_v28  ;;  %v425_v28 = vld [vmem:[%s2515_s3 + $0x40] sm:$0xff] }
  0x55   :  { %1598 = vmatpush1.bf16.msra.mxu0 %v1597_v33  ;;  %v1621_v33 = vpack.c.bf16 %v876_v25, %v874_v24  ;;  %v1277_v24 = vld [vmem:[%s2515_s3 + $0x270] sm:$0xff] }
  0x56   :  { %1600 = vmatprep.subr.bf16.mxu0 %v1599_v34  ;;  %v1509_v34 = vpack.c.bf16 %v427_v29, %v425_v28 }
  0x59   :  { %1602 = vmatpush1.bf16.msra.mxu0 %v1601_v39  ;;  %v436_v39 = vld [vmem:[%s2515_s3 + $0x98] sm:$0xff] }
  0x5a   :  { %1604 = vmatprep.subr.bf16.mxu0 %v1603_v40  ;;  %v1513_v40 = vpack.c.bf16 %v431_v37, %v429_v36  ;;  %v1515_v41 = vpack.c.bf16 %v436_v39, %v434_v38  ;;  %v1283_v37 = vld [vmem:[%s2515_s3 + $0x2a0] sm:$0xff]  ;;  %v1285_v38 = vld [vmem:[%s2515_s3 + $0x2b0] sm:$0xff]  ;;  %v1288_v39 = vld [vmem:[%s2515_s3 + $0x2c8] sm:$0xff] }
  0x5d   :  { %1606 = vmatpush1.bf16.msra.mxu0 %v1605_v45  ;;  %v440_v45 = vld [vmem:[%s2515_s3 + $0xb8] sm:$0xff] }
  0x5e   :  { %1608 = vmatprep.subr.bf16.mxu0 %v1607_v46  ;;  %v1517_v46 = vpack.c.bf16 %v435_v43, %v433_v42  ;;  %v1519_v47 = vpack.c.bf16 %v440_v45, %v438_v44  ;;  %v1287_v43 = vld [vmem:[%s2515_s3 + $0x2c0] sm:$0xff]  ;;  %v1289_v44 = vld [vmem:[%s2515_s3 + $0x2d0] sm:$0xff]  ;;  %v1292_v45 = vld [vmem:[%s2515_s3 + $0x2e8] sm:$0xff] }
  0x61   :  { %1610 = vmatpush1.bf16.msra.mxu0 %v1609_v52  ;;  %v1521_v52 = vpack.c.bf16 %v439_v49, %v437_v48  ;;  %v1291_v49 = vld [vmem:[%s2515_s3 + $0x2e0] sm:$0xff] }
  0x62   :  { %1612 = vmatprep.subr.bf16.mxu0 %v1611_v53 }
  0x65   :  { %1614 = vmatpush1.bf16.msra.mxu0 %v1613_v2  ;;  %v1263_v2 = vld [vmem:[%s2515_s3 + $0x200] sm:$0xff] }
  0x66   :  { %1616 = vmatprep.subr.bf16.mxu0 %v1615_v14 }
  0x69   :  { %1618 = vmatpush1.bf16.msra.mxu0 %v1617_v21 }
  0x6a   :  { %1620 = vmatprep.subr.bf16.mxu0 %v1619_v30  ;;  %v1279_v30 = vld [vmem:[%s2515_s3 + $0x280] sm:$0xff] }
  0x6d   :  { %1622 = vmatpush1.bf16.msra.mxu0 %v1621_v33  ;;  %v1284_v33 = vld [vmem:[%s2515_s3 + $0x2a8] sm:$0xff] }
 0x107   :  { %v1404_v56 = vpop.f32.mrb[0].mxu0 }
 0x108   :  { %v394_v60 = vadd.f32 %v1404_v56, %v1230_v51  ;;  %v363_v61 = vpop.f32.mrb[1].mxu0  ;;  %v446_v56 = vld [vmem:[%s2515_s3 + $0xe8] sm:$0xff] }
 0x109   :  { %v393_v1 = vadd.f32 %v1230_v51, %v363_v61  ;;  %v1527_v59 = vpack.c.bf16 %v448_v57, %v446_v56  ;;  %v447_v61 = vld [vmem:[%s2515_s3 + $0xf0] sm:$0xff]  ;;  %v879_v56 = vld [vmem:[%s2517_s5 + $0x1e8] sm:$0xff]  ;;  %v881_v57 = vld [vmem:[%s2517_s5 + $0x1f8] sm:$0xff] }
 0x10a   :  { %v398_v3 = vmax.f32 %v394_v60, 0.0  ;;  %v445_v60 = vld [vmem:[%s2515_s3 + $0xe0] sm:$0xff] }
 0x10b   :  { %v397_v8 = vmax.f32 %v393_v1, 0.0  ;;  %v1407_v9 = vpop.f32.mrb[2].mxu0  ;;  %v1529_v0 = vpack.c.bf16 %v447_v61, %v445_v60  ;;  %v1531_v1 = vpack.c.bf16 %v1266_v63, %v1264_v62  ;;  %v880_v60 = vld [vmem:[%s2517_s5 + $0x1f0] sm:$0xff]  ;;  %v987_v61 = vld [vmem:[%s2519_s7] sm:$0xff]  ;;  %v988_v62 = vld [vmem:[%s2519_s7 + $0x8] sm:$0xff] }
 0x10c   :  { %410 = vst [vmem:[#allocation3 + $0x10] sm:$0xff] %v398_v3  ;;  %v396_v15 = vadd.f32 %v1407_v9, %v1230_v51  ;;  %v373_v16 = vpop.f32.mrb[3].mxu0  ;;  %v1267_v9 = vld [vmem:[%s2515_s3 + $0x220] sm:$0xff]  ;;  %v989_v63 = vld [vmem:[%s2519_s7 + $0x10] sm:$0xff] }
 0x10d   :  { %409 = vst [vmem:[#allocation3 + $0x8] sm:$0xff] %v397_v8  ;;  %v395_v20 = vadd.f32 %v1230_v51, %v373_v16  ;;  %551 = vmatmul.mubr.f32.vlgmr.msra.gmra.mrb[0].mxu1 %v397_v8  ;;  %v444_v51 = vld [vmem:[%s2515_s3 + $0xd8] sm:$0xff]  ;;  %v1271_v16 = vld [vmem:[%s2515_s3 + $0x240] sm:$0xff] }
 0x10e   :  { %v400_v22 = vmax.f32 %v396_v15, 0.0  ;;  %1502 = vmatpush1.bf16.msra.mxu1 %v1501_v4  ;;  %556 = vmatprep.mubr.f32.mxu1 %v1716_v5  ;;  %v1523_v53 = vpack.c.bf16 %v444_v51, %v442_v50  ;;  %v1268_v4 = vld [vmem:[%s2515_s3 + $0x228] sm:$0xff]  ;;  %v1539_v15 = vpack.c.bf16 %v1274_v13, %v1272_v12  ;;  %v1541_v21 = vpack.c.bf16 %v1273_v17, %v1271_v16  ;;  %v1293_v50 = vld [vmem:[%s2515_s3 + $0x2f0] sm:$0xff]  ;;  %v999_v17 = vld [vmem:[%s2519_s7 + $0x60] sm:$0xff] }
 0x10f   :  { %v399_v26 = vmax.f32 %v395_v20, 0.0  ;;  %1504 = vmatprep.subr.bf16.mxu1 %v1503_v10  ;;  %v1535_v8 = vpack.c.bf16 %v1270_v6, %v1268_v4  ;;  %v1269_v10 = vld [vmem:[%s2515_s3 + $0x230] sm:$0xff]  ;;  %v1278_v20 = vld [vmem:[%s2515_s3 + $0x278] sm:$0xff]  ;;  %v1561_v51 = vpack.c.bf16 %v1293_v50, %v1291_v49  ;;  %v991_v4 = vld [vmem:[%s2519_s7 + $0x20] sm:$0xff] }
 0x110   :  { %412 = vst [vmem:[#allocation3 + $0x30] sm:$0xff] %v400_v22  ;;  %v1537_v14 = vpack.c.bf16 %v1269_v10, %v1267_v9  ;;  %v992_v6 = vld [vmem:[%s2519_s7 + $0x28] sm:$0xff]  ;;  %v994_v9 = vld [vmem:[%s2519_s7 + $0x38] sm:$0xff]  ;;  %v1005_v49 = vld [vmem:[%s2519_s7 + $0x90] sm:$0xff] }
 0x111   :  { %411 = vst [vmem:[#allocation3 + $0x28] sm:$0xff] %v399_v26  ;;  %557 = vmatmul.mubr.f32.gmra.mrb[2].mxu1 %v398_v3  ;;  %v1265_v3 = vld [vmem:[%s2515_s3 + $0x210] sm:$0xff]  ;;  %v996_v12 = vld [vmem:[%s2519_s7 + $0x48] sm:$0xff]  ;;  %v1006_v50 = vld [vmem:[%s2519_s7 + $0x98] sm:$0xff] }
 0x112   :  { %1506 = vmatpush1.bf16.msra.mxu1 %v1505_v23  ;;  %562 = vmatprep.mubr.f32.mxu1 %v1716_v5  ;;  %v1533_v7 = vpack.c.bf16 %v1265_v3, %v1263_v2  ;;  %v1275_v23 = vld [vmem:[%s2515_s3 + $0x260] sm:$0xff]  ;;  %v990_v2 = vld [vmem:[%s2519_s7 + $0x18] sm:$0xff] }
 0x113   :  { %1508 = vmatprep.subr.bf16.mxu1 %v1507_v27  ;;  %v1282_v27 = vld [vmem:[%s2515_s3 + $0x298] sm:$0xff]  ;;  %v1545_v28 = vpack.c.bf16 %v1277_v24, %v1275_v23  ;;  %v1631_v3 = vpack.c.bf16 %v990_v2, %v989_v63  ;;  %v1003_v23 = vld [vmem:[%s2519_s7 + $0x80] sm:$0xff]  ;;  %v1004_v24 = vld [vmem:[%s2519_s7 + $0x88] sm:$0xff] }
 0x114   :  { %v413_v11 = vld [vmem:[#allocation3 + $0x7] sm:$0xff]  ;;  %v414_v18 = vld [vmem:[#allocation3 + $0xf] sm:$0xff] }
 0x115   :  { %563 = vmatmul.mubr.f32.gmra.mrb[4].mxu1 %v399_v26  ;;  %v1280_v26 = vld [vmem:[%s2515_s3 + $0x288] sm:$0xff]  ;;  %v975_v2 = vld [vmem:[%s2518_s6 + $0x20] sm:$0xff] }
 0x116   :  { %1510 = vmatpush1.bf16.msra.mxu1 %v1509_v34  ;;  %568 = vmatprep.mubr.f32.mxu1 %v1716_v5  ;;  %v1547_v29 = vpack.c.bf16 %v1282_v27, %v1280_v26  ;;  %v1286_v34 = vld [vmem:[%s2515_s3 + $0x2b8] sm:$0xff]  ;;  %v800_v26 = vlaneseq  ;;  %v976_v63 = vld [vmem:[%s2518_s6 + $0x28] sm:$0xff] }
 0x117   :  { %1512 = vmatprep.subr.bf16.mxu1 %v1511_v35  ;;  %v1549_v35 = vpack.c.bf16 %v1281_v31, %v1279_v30  ;;  %v1551_v36 = vpack.c.bf16 %v1286_v34, %v1284_v33  ;;  %v667_v55 = vld [vmem:[#allocation3 + $0x31] sm:$0xff] }
 0x118   :  { %v415_v25 = vld [vmem:[#allocation3 + $0x27] sm:$0xff]  ;;  %v416_v32 = vld [vmem:[#allocation3 + $0x2f] sm:$0xff]  ;;  %v801_v27 = vshrl.u32 %v800_v26, 7 }
 0x119   :  { %569 = vmatmul.mubr.f32.gmra.mrb[6].mxu1 %v400_v22  ;;  %v1543_v22 = vpack.c.bf16 %v1278_v20, %v1276_v19  ;;  %v666_v54 = vld [vmem:[#allocation3 + $0x29] sm:$0xff] }
 0x11a   :  { %1514 = vmatpush1.bf16.msra.mxu1 %v1513_v40  ;;  %639 = vmatprep.mubr.f32.mxu1 %v1716_v5  ;;  %v1290_v40 = vld [vmem:[%s2515_s3 + $0x2d8] sm:$0xff]  ;;  %v1001_v20 = vld [vmem:[%s2519_s7 + $0x70] sm:$0xff]  ;;  %v802_v30 = vsub.s32 0, %v801_v27 }
 0x11b   :  { %1516 = vmatprep.subr.bf16.mxu1 %v1515_v41  ;;  %v1553_v41 = vpack.c.bf16 %v1285_v38, %v1283_v37  ;;  %v1555_v42 = vpack.c.bf16 %v1290_v40, %v1288_v39 }
 0x11e   :  { %1518 = vmatpush1.bf16.msra.mxu1 %v1517_v46  ;;  %v1294_v46 = vld [vmem:[%s2515_s3 + $0x2f8] sm:$0xff] }
 0x11f   :  { %1520 = vmatprep.subr.bf16.mxu1 %v1519_v47  ;;  %v1557_v47 = vpack.c.bf16 %v1289_v44, %v1287_v43  ;;  %v1559_v48 = vpack.c.bf16 %v1294_v46, %v1292_v45 }
 0x122   :  { %1522 = vmatpush1.bf16.msra.mxu1 %v1521_v52  ;;  %v664_v52 = vld [vmem:[#allocation3 + $0x9] sm:$0xff] }
 0x123   :  { %1524 = vmatprep.subr.bf16.mxu1 %v1523_v53  ;;  %v665_v53 = vld [vmem:[#allocation3 + $0x11] sm:$0xff] }
 0x126   :  { %1526 = vmatpush1.bf16.msra.mxu1 %v1525_v58  ;;  %v1623_v58 = vpack.c.bf16 %v881_v57, %v879_v56 }
 0x127   :  { %1528 = vmatprep.subr.bf16.mxu1 %v1527_v59  ;;  %v878_v59 = vld [vmem:[%s2517_s5 + $0x1e0] sm:$0xff] }
 0x128   :  { %1624 = vmatprep.subr.bf16.mxu0 %v1623_v58  ;;  %v974_v58 = vld [vmem:[%s2518_s6 + $0x18] sm:$0xff] }
 0x12a   :  { %1530 = vmatpush1.bf16.msra.mxu1 %v1529_v0  ;;  %v1717_v0 = vmov 0.0|0.0  }
 0x12b   :  { %1532 = vmatprep.subr.bf16.mxu1 %v1531_v1  ;;  %v1628_v1 = vpack.c.bf16 %v988_v62, %v987_v61 }
 0x12d   :  { %640 = vmatmul.mubr.f32.vlgmr.msra.gmra.mrb[0].mxu1 %v413_v11  ;;  %v995_v11 = vld [vmem:[%s2519_s7 + $0x40] sm:$0xff] }
 0x12e   :  { %1534 = vmatpush1.bf16.msra.mxu1 %v1533_v7  ;;  %645 = vmatprep.mubr.f32.mxu1 %v1716_v5  ;;  %v1634_v7 = vpack.c.bf16 %v992_v6, %v991_v4  ;;  %v1640_v13 = vpack.c.bf16 %v996_v12, %v995_v11 }
 0x12f   :  { %1536 = vmatprep.subr.bf16.mxu1 %v1535_v8  ;;  %v993_v8 = vld [vmem:[%s2519_s7 + $0x30] sm:$0xff] }
 0x130   :  { %v1637_v10 = vpack.c.bf16 %v994_v9, %v993_v8  ;;  %v977_v9 = vld [vmem:[%s2518_s6 + $0x30] sm:$0xff] }
 0x131   :  { %646 = vmatmul.mubr.f32.gmra.mrb[2].mxu1 %v414_v18  ;;  %v1000_v18 = vld [vmem:[%s2519_s7 + $0x68] sm:$0xff] }
 0x132   :  { %1538 = vmatpush1.bf16.msra.mxu1 %v1537_v14  ;;  %651 = vmatprep.mubr.f32.mxu1 %v1716_v5  ;;  %v997_v14 = vld [vmem:[%s2519_s7 + $0x50] sm:$0xff]  ;;  %v1646_v19 = vpack.c.bf16 %v1000_v18, %v999_v17 }
 0x133   :  { %1540 = vmatprep.subr.bf16.mxu1 %v1539_v15  ;;  %v998_v15 = vld [vmem:[%s2519_s7 + $0x58] sm:$0xff] }
 0x134   :  { %v1643_v16 = vpack.c.bf16 %v998_v15, %v997_v14 }
 0x135   :  { %652 = vmatmul.mubr.f32.gmra.mrb[4].mxu1 %v415_v25  ;;  %v1652_v25 = vpack.c.bf16 %v1004_v24, %v1003_v23  ;;  %v1105_v24 = vld [vmem:[%s2520_s8] sm:$0x3] }
 0x136   :  { %1542 = vmatpush1.bf16.msra.mxu1 %v1541_v21  ;;  %657 = vmatprep.mubr.f32.mxu1 %v1716_v5  ;;  %v1002_v21 = vld [vmem:[%s2519_s7 + $0x78] sm:$0xff] }
 0x137   :  { %1544 = vmatprep.subr.bf16.mxu1 %v1543_v22  ;;  %v1649_v22 = vpack.c.bf16 %v1002_v21, %v1001_v20 }
 0x139   :  { %658 = vmatmul.mubr.f32.gmra.mrb[6].mxu1 %v416_v32 }
 0x13a   :  { %1546 = vmatpush1.bf16.msra.mxu1 %v1545_v28  ;;  %765 = vmatprep.mubr.f32.mxu1 %v1716_v5  ;;  %v806_v28 = vsub.s32 1, %v801_v27 }
 0x13b   :  { %1548 = vmatprep.subr.bf16.mxu1 %v1547_v29  ;;  %v798_v29 = vld [vmem:[%s2516_s4] sm:$0x3] }
 0x13c   :  { %v807_v31 = vrot.slane %v798_v29, %v806_v28  ;;  %v803_v32 = vrot.slane %v798_v29, %v802_v30 }
 0x13e   :  { %1550 = vmatpush1.bf16.msra.mxu1 %v1549_v35 }
 0x13f   :  { %1552 = vmatprep.subr.bf16.mxu1 %v1551_v36 }
 0x142   :  { %1554 = vmatpush1.bf16.msra.mxu1 %v1553_v41 }
 0x143   :  { %1556 = vmatprep.subr.bf16.mxu1 %v1555_v42 }
 0x146   :  { %1558 = vmatpush1.bf16.msra.mxu1 %v1557_v47 }
 0x147   :  { %1560 = vmatprep.subr.bf16.mxu1 %v1559_v48 }
 0x14a   :  { %1562 = vmatpush1.bf16.msra.mxu1 %v1561_v51  ;;  %v1655_v51 = vpack.c.bf16 %v1006_v50, %v1005_v49 }
 0x14b   :  { %1627 = vmatprep.subr.bf16.mxu1 %v1717_v0 }
 0x14d   :  { %766 = vmatmul.mubr.f32.vlgmr.msra.gmra.mrb[0].mxu1 %v664_v52  ;;  %v972_v52 = vld [vmem:[%s2518_s6 + $0x8] sm:$0xff] }
 0x14e   :  { %771 = vmatprep.mubr.f32.mxu1 %v1716_v5  ;;  %1629 = vmatpush1.bf16.msra.mxu1 %v1628_v1 }
 0x14f   :  { %1630 = vmatprep.subr.bf16.mxu1 %v1717_v0 }
 0x151   :  { %772 = vmatmul.mubr.f32.gmra.mrb[2].mxu1 %v665_v53 }
 0x152   :  { %777 = vmatprep.mubr.f32.mxu1 %v1716_v5  ;;  %1632 = vmatpush1.bf16.msra.mxu1 %v1631_v3 }
 0x153   :  { %1633 = vmatprep.subr.bf16.mxu1 %v1717_v0 }
 0x155   :  { %778 = vmatmul.mubr.f32.gmra.mrb[4].mxu1 %v666_v54  ;;  %v971_v54 = vld [vmem:[%s2518_s6] sm:$0xff] }
 0x156   :  { %783 = vmatprep.mubr.f32.mxu1 %v1716_v5  ;;  %v1625_v5 = vpack.c.bf16 %v880_v60, %v878_v59  ;;  %1635 = vmatpush1.bf16.msra.mxu1 %v1634_v7  ;;  %v973_v60 = vld [vmem:[%s2518_s6 + $0x10] sm:$0xff]  ;;  %v978_v7 = vld [vmem:[%s2518_s6 + $0x38] sm:$0xff] }
 0x157   :  { %1636 = vmatprep.subr.bf16.mxu1 %v1717_v0 }
 0x158   :  { %1626 = vmatpush1.bf16.msra.mxu0 %v1625_v5 }
 0x159   :  { %784 = vmatmul.mubr.f32.gmra.mrb[6].mxu1 %v667_v55  ;;  %1657 = vmatprep.subr.bf16.mxu0 %v1717_v0 }
 0x15a   :  { %1638 = vmatpush1.bf16.msra.mxu1 %v1637_v10 }
 0x15b   :  { %1639 = vmatprep.subr.bf16.mxu1 %v1717_v0 }
 0x15e   :  { %1641 = vmatpush1.bf16.msra.mxu1 %v1640_v13  ;;  %v1691_v13 = vld [vmem:[#allocation3] sm:$0xff] }
 0x15f   :  { %1642 = vmatprep.subr.bf16.mxu1 %v1717_v0 }
 0x162   :  { %1644 = vmatpush1.bf16.msra.mxu1 %v1643_v16 }
 0x163   :  { %1645 = vmatprep.subr.bf16.mxu1 %v1717_v0 }
 0x166   :  { %1647 = vmatpush1.bf16.msra.mxu1 %v1646_v19 }
 0x167   :  { %1648 = vmatprep.subr.bf16.mxu1 %v1717_v0 }
 0x16a   :  { %1650 = vmatpush1.bf16.msra.mxu1 %v1649_v22 }
 0x16b   :  { %1651 = vmatprep.subr.bf16.mxu1 %v1717_v0 }
 0x16e   :  { %1653 = vmatpush1.bf16.msra.mxu1 %v1652_v25  ;;  %v1299_v25 = vld [vmem:[%s2521_s9] ss:$0 sm:$0xff] }
 0x16f   :  { %1654 = vmatprep.subr.bf16.mxu1 %v1717_v0 }
 0x172   :  { %1656 = vmatpush1.bf16.msra.mxu1 %v1655_v51 }
 0x220   :  { %v767_v33 = vpop.f32.mrb[0].mxu1 }
 0x221   :  { %v769_v34 = vpop.f32.mrb[1].mxu1  ;;  %v810_v36 = vadd.f32 %v803_v32, %v767_v33 }
 0x222   :  { %v811_v35 = vadd.f32 %v807_v31, %v769_v34 }
 0x224   :  { %v773_v37 = vpop.f32.mrb[2].mxu1  ;;  %946 = vmatprep.mubr.f32.mxu0 %v811_v35 }
 0x225   :  { %v775_v38 = vpop.f32.mrb[3].mxu1  ;;  %947 = vmatmul.mubr.f32.vlgmr.msra.gmra.mrb[4].mxu0 %v810_v36  ;;  %v812_v40 = vadd.f32 %v803_v32, %v773_v37 }
 0x226   :  { %v813_v39 = vadd.f32 %v807_v31, %v775_v38 }
 0x228   :  { %v779_v41 = vpop.f32.mrb[4].mxu1  ;;  %952 = vmatprep.mubr.f32.mxu0 %v813_v39 }
 0x229   :  { %v781_v42 = vpop.f32.mrb[5].mxu1  ;;  %953 = vmatmul.mubr.f32.gmra.mrb[6].mxu0 %v812_v40  ;;  %v814_v44 = vadd.f32 %v803_v32, %v779_v41 }
 0x22a   :  { %v815_v43 = vadd.f32 %v807_v31, %v781_v42 }
 0x22c   :  { %v785_v45 = vpop.f32.mrb[6].mxu1  ;;  %958 = vmatprep.mubr.f32.mxu0 %v815_v43 }
 0x22d   :  { %v787_v46 = vpop.f32.mrb[7].mxu1  ;;  %959 = vmatmul.mubr.f32.gmra.mrb[8].mxu0 %v814_v44  ;;  %v816_v48 = vadd.f32 %v803_v32, %v785_v45 }
 0x22e   :  { %v817_v47 = vadd.f32 %v807_v31, %v787_v46 }
 0x230   :  { %964 = vmatprep.mubr.f32.mxu0 %v817_v47 }
 0x231   :  { %965 = vmatmul.mubr.f32.gmra.mrb[10].mxu0 %v816_v48 }
 0x232   :  { %1416 = vmatprep.mubr.msk.f32.mxu0 %vm1718_vm2, %v1691_v13 }
 0x2f8   :  { %v948_v53 = vpop.f32.mrb[4].mxu0 }
 0x2f9   :  { %v950_v55 = vpop.f32.mrb[5].mxu0  ;;  %v979_v57 = vmul.f32 %v971_v54, %v948_v53 }
 0x2fa   :  { %v980_v56 = vmul.f32 %v972_v52, %v950_v55 }
 0x2fc   :  { %v954_v59 = vpop.f32.mrb[6].mxu0  ;;  %1295 = vmatprep.mubr.msk.f32.mxu1 %vm1007_vm1, %v980_v56 }
 0x2fd   :  { %v956_v5 = vpop.f32.mrb[7].mxu0  ;;  %1085 = vmatmul.mubr.f32.vlgmr.msra.gmra.mrb[8].mxu1 %v979_v57  ;;  %v981_v62 = vmul.f32 %v973_v60, %v954_v59 }
 0x2fe   :  { %v982_v61 = vmul.f32 %v974_v58, %v956_v5 }
 0x300   :  { %v960_v1 = vpop.f32.mrb[8].mxu0  ;;  %1296 = vmatprep.mubr.msk.f32.mxu1 %vm1007_vm1, %v982_v61 }
 0x301   :  { %v962_v3 = vpop.f32.mrb[9].mxu0  ;;  %1090 = vmatmul.mubr.f32.gmra.mrb[10].mxu1 %v981_v62  ;;  %v983_v6 = vmul.f32 %v975_v2, %v960_v1 }
 0x302   :  { %v984_v4 = vmul.f32 %v976_v63, %v962_v3 }
 0x304   :  { %v966_v8 = vpop.f32.mrb[10].mxu0  ;;  %1297 = vmatprep.mubr.msk.f32.mxu1 %vm1007_vm1, %v984_v4 }
 0x305   :  { %v968_v10 = vpop.f32.mrb[11].mxu0  ;;  %1095 = vmatmul.mubr.f32.gmra.mrb[12].mxu1 %v983_v6  ;;  %v985_v12 = vmul.f32 %v977_v9, %v966_v8 }
 0x306   :  { %v986_v11 = vmul.f32 %v978_v7, %v968_v10 }
 0x308   :  { %1298 = vmatprep.mubr.msk.f32.mxu1 %vm1007_vm1, %v986_v11 }
 0x309   :  { %1100 = vmatmul.mubr.f32.gmra.mrb[14].mxu1 %v985_v12 }
 0x3d0   :  { %v1086_v14 = vpop.f32.mrb[8].mxu1 }
 0x3d1   :  { %v1088_v15 = vpop.f32.mrb[9].mxu1 }
 0x3d4   :  { %v1091_v16 = vpop.f32.mrb[10].mxu1 }
 0x3d5   :  { %v1658_v17 = vpack.c.bf16 %v1091_v16, %v1086_v14  ;;  %v1093_v18 = vpop.f32.mrb[11].mxu1 }
 0x3d7   :  { %1659 = vmatpush3.bf16.msra.mxu0 %v1658_v17 }
 0x3d8   :  { %v1096_v19 = vpop.f32.mrb[12].mxu1  ;;  %1660 = vmatprep.subr.bf16.mxu0 %v1717_v0 }
 0x3d9   :  { %v1098_v20 = vpop.f32.mrb[13].mxu1 }
 0x3dc   :  { %v1101_v21 = vpop.f32.mrb[14].mxu1 }
 0x3dd   :  { %v1661_v22 = vpack.c.bf16 %v1101_v21, %v1096_v19  ;;  %v1103_v23 = vpop.f32.mrb[15].mxu1 }
 0x3df   :  { %1662 = vmatpush3.bf16.msra.mxu0 %v1661_v22 }
 0x3e2   :  { %1417 = vmatmul.mubr.msk.f32.vlgmr.msra.gmra.mrb[12].mxu0 %vm1007_vm1, %v1105_v24 }
 0x4b5   :  { %v1182_v26 = vpop.f32.mrb[12].mxu0 }
 0x4b6   :  { %v1183_v0 = vadd.f32 %v1299_v25, %v1182_v26  ;;  %v1418_v27 = vpop.f32.mrb[13].mxu0 }
 0x4b8   :  { %1187 = vst.msk [vmem:[#allocation4] sm:$0x3] %vm1186_vm3, %v1183_v0 }
 0x4b9   :  { %1703 = shalt.err (!%p1700_p4)
}
 0x4ba   :  { %s1704_s4 = scalar_lea.hbm %s2522_s10, 32 }
 0x4bb   :  { %p1705_p5 = scmp.ne.s32.totalorder %s2522_s10, %s1704_s4  ;;  %p1708_p6 = scmp.lt.u32.totalorder %s1704_s4, %s2522_s10 }
 0x4bd   :  { %p1710_p7 = pnand %p1708_p6, %p1705_p5 }
 0x4bf   :  { %1713 = shalt.err (!%p1710_p7)
}
 0x4c0   :  { %1197 = dma.vmem_to_hbm [thread:$0]  %s1195_s23, 32, %s2522_s10, [#allocation5]  }
 0x4c1   :  { %1714 = dma.done.wait [#allocation5], 32  }
 0x4c2   :  { %1715 = vsyncadd [#allocation5], 4294967264 }
 0x4c3   :  { %1201 = vsyncpa [#allocation5], 1 }

</bundles_post_ra>
